<compile_context>
chip_gen: v7x
topology: tpu7x:2x2x1
jax: 0.10.0
libtpu: 0.0.40
codegen_flags: <defaults>
</compile_context>

<pallas_src>
import jax
import jax.numpy as jnp
from jax.experimental import pallas as pl
from jax.experimental.pallas import tpu as pltpu


# ----------------------------------------------------------------------------
# Kernel: one grid step processes a (batch_tile, T, D) slab.
# ----------------------------------------------------------------------------
def mha_kernel(x_ref, wqkv_ref, wo_ref, bo_ref, o_ref):
    bb, T, D = x_ref.shape            # activations block
    H, dh, Dout = wo_ref.shape        # output projection stored (H, dh, D)
    scale = float(dh) ** -0.5

    # Flatten batch*time for the big projection matmuls (sublane fill).
    x2d = x_ref[...].reshape(bb * T, D)                     # bf16 (cast at boundary)

    # Fused QKV projection: one lane-aligned MXU matmul, f32 accumulation.
    qkv = jnp.dot(x2d, wqkv_ref[...],
                  preferred_element_type=jnp.float32)       # (bb*T, 3*H*dh) f32

    # Causal (lower-triangular) mask, shared by every head / batch row.
    row = jax.lax.broadcasted_iota(jnp.int32, (T, T), 0)
    col = jax.lax.broadcasted_iota(jnp.int32, (T, T), 1)
    causal = (row >= col)[None]                             # (1, T, T)
    neg_big = jnp.float32(-1e30)                            # robust vs -inf

    acc = jnp.zeros((bb * T, Dout), jnp.float32)

    # Static unrolled loop over heads; attention itself is batched over `bb`.
    for h in range(H):
        lo = h * dh
        q = qkv[:, lo:lo + dh].reshape(bb, T, dh).astype(jnp.bfloat16)
        k = qkv[:, H * dh + lo:H * dh + lo + dh].reshape(bb, T, dh).astype(jnp.bfloat16)
        v = qkv[:, 2 * H * dh + lo:2 * H * dh + lo + dh].reshape(bb, T, dh).astype(jnp.bfloat16)

        # scores: transpose folded into dot_general (no explicit k.T)
        s = jnp.einsum('bqd,bkd->bqk', q, k,
                       preferred_element_type=jnp.float32) * scale   # (bb, T, T) f32
        s = jnp.where(causal, s, neg_big)

        # explicit softmax, f32 stats, divide via EUP reciprocal
        m = jnp.max(s, axis=-1, keepdims=True)
        p = jnp.exp(s - m)
        l = jnp.sum(p, axis=-1, keepdims=True)
        p = p * pl.reciprocal(l, approx=True)
        # (dropout on attention weights == identity in eval mode)

        ctx = jnp.einsum('bqk,bkd->bqd', p.astype(jnp.bfloat16), v,
                         preferred_element_type=jnp.float32)          # (bb, T, dh)

        # Fused "concat + output projection": accumulate this head's slice of W_o.
        acc = acc + jnp.dot(ctx.reshape(bb * T, dh).astype(jnp.bfloat16),
                            wo_ref[h], preferred_element_type=jnp.float32)

    out = acc + bo_ref[...]                                  # (bb*T, D) + (1, D)
    # (output dropout == identity in eval mode)
    o_ref[...] = out.reshape(bb, T, Dout).astype(o_ref.dtype)


# ----------------------------------------------------------------------------
# Wrapper
#   x    : (B, T, D)  float32
#   wqkv : (D, 3*H*dh)  packed [Q | K | V], each (D, H*dh) with head-major cols
#   wo3  : (H, dh, D)   output projection, reshaped from (H*dh, D)
#   bo   : (1, D)
# ----------------------------------------------------------------------------
def multi_head_attention(x, wqkv, wo3, bo, *, batch_tile=None):
    B, T, D = x.shape
    H, dh, Dout = wo3.shape

    if batch_tile is None:
        batch_tile = B          # tiny demo: fold whole batch into one grid step
    assert B % batch_tile == 0
    grid = (B // batch_tile,)

    # bf16 at the kernel boundary (halves DMA bytes); f32 accumulation inside.
    x_bf = x.astype(jnp.bfloat16)
    wqkv_bf = wqkv.astype(jnp.bfloat16)
    wo_bf = wo3.astype(jnp.bfloat16)
    bo_f32 = bo.astype(jnp.float32)

    return pl.pallas_call(
        mha_kernel,
        out_shape=jax.ShapeDtypeStruct((B, T, Dout), jnp.float32),
        grid=grid,
        in_specs=[
            pl.BlockSpec((batch_tile, T, D), lambda i: (i, 0, 0)),
            pl.BlockSpec(wqkv_bf.shape, lambda i: (0, 0)),
            pl.BlockSpec(wo_bf.shape, lambda i: (0, 0, 0)),
            pl.BlockSpec(bo_f32.shape, lambda i: (0, 0)),
        ],
        out_specs=pl.BlockSpec((batch_tile, T, Dout), lambda i: (i, 0, 0)),
        compiler_params=pltpu.CompilerParams(dimension_semantics=("parallel",)),
    )(x_bf, wqkv_bf, wo_bf, bo_f32)


# ----------------------------------------------------------------------------
# Pure-JAX f32 reference (mirrors the PyTorch module, eval mode)
# ----------------------------------------------------------------------------
def mha_reference(x, wq, wk, wv, wo, bo):
    B, T, D = x.shape
    H, _, dh = wq.shape
    mask = jnp.tril(jnp.ones((T, T), bool))
    outs = []
    for h in range(H):
        q = x @ wq[h]
        k = x @ wk[h]
        v = x @ wv[h]
        s = jnp.einsum('btd,bsd->bts', q, k) * float(dh) ** -0.5
        s = jnp.where(mask, s, -jnp.inf)
        p = jax.nn.softmax(s, axis=-1)
        outs.append(jnp.einsum('bts,bsd->btd', p, v))
    cat = jnp.concatenate(outs, axis=-1)
    return cat @ wo + bo


# ----------------------------------------------------------------------------
if __name__ == "__main__":
    B, T = 2, 8               # batch, block_size
    H, DH = 4, 32             # n_heads, d_head  -> H*DH = 128 (lane-dense)
    D = 128                   # d_embed          -> lane-dense activations

    key = jax.random.PRNGKey(0)
    kq, kk, kv, ko, kx = jax.random.split(key, 5)
    std = 0.02
    wq = std * jax.random.normal(kq, (H, D, DH), jnp.float32)   # stored (in, out)
    wk = std * jax.random.normal(kk, (H, D, DH), jnp.float32)
    wv = std * jax.random.normal(kv, (H, D, DH), jnp.float32)
    wo = std * jax.random.normal(ko, (H * DH, D), jnp.float32)
    bo = jnp.zeros((1, D), jnp.float32)
    x = jax.random.normal(kx, (B, T, D), jnp.float32)

    # Pack weights for the fused kernel (done once, outside the kernel).
    def _stack(w):                       # (H, D, dh) -> (D, H*dh), head-major cols
        return w.transpose(1, 0, 2).reshape(D, H * DH)

    wqkv = jnp.concatenate([_stack(wq), _stack(wk), _stack(wv)], axis=1)  # (D, 3*H*dh)
    wo3 = wo.reshape(H, DH, D)                                            # (H, dh, D)

    out = multi_head_attention(x, wqkv, wo3, bo)
    jax.block_until_ready(out)

    ref = mha_reference(x, wq, wk, wv, wo, bo)

    assert out.shape == (B, T, D)
    assert bool(jnp.all(jnp.isfinite(out)))
    max_err = float(jnp.max(jnp.abs(out - ref)))
    assert max_err < 2e-2, f"kernel deviates from reference: max_err={max_err}"
    print("KERNEL_OK")
</pallas_src>

<mosaic_0001>
module attributes {stable_mosaic.version = 11 : i64} {
  func.func @mha_kernel(%arg0: i32, %arg1: memref<2x8x128xbf16, #tpu.memory_space<vmem>>, %arg2: memref<128x384xbf16, #tpu.memory_space<vmem>>, %arg3: memref<4x32x128xbf16, #tpu.memory_space<vmem>>, %arg4: memref<1x128xf32, #tpu.memory_space<vmem>>, %arg5: memref<2x8x128xf32, #tpu.memory_space<vmem>>) attributes {dimension_semantics = [#tpu.dimension_semantics<parallel>], iteration_bounds = array<i64: 1>, scalar_prefetch = 0 : i64, scratch_operands = 0 : i64, tpu.core_type = #tpu.core_type<tc>, window_params = [{transform_indices = @transform_0, window_bounds = array<i64: 2, 8, 128>}, {pipeline_mode = #tpu.pipeline_mode<synchronous>, transform_indices = @transform_1, window_bounds = array<i64: 128, 384>}, {pipeline_mode = #tpu.pipeline_mode<synchronous>, transform_indices = @transform_2, window_bounds = array<i64: 4, 32, 128>}, {pipeline_mode = #tpu.pipeline_mode<synchronous>, transform_indices = @transform_3, window_bounds = array<i64: 1, 128>}, {transform_indices = @transform_4, window_bounds = array<i64: 2, 8, 128>}]} {
    %c0 = arith.constant 0 : index
    %c0_0 = arith.constant 0 : index
    %c0_1 = arith.constant 0 : index
    %0 = vector.load %arg1[%c0, %c0_0, %c0_1] : memref<2x8x128xbf16, #tpu.memory_space<vmem>>, vector<2x8x128xbf16>
    %1 = vector.shape_cast %0 : vector<2x8x128xbf16> to vector<16x128xbf16>
    %c0_2 = arith.constant 0 : index
    %c0_3 = arith.constant 0 : index
    %2 = vector.load %arg2[%c0_2, %c0_3] : memref<128x384xbf16, #tpu.memory_space<vmem>>, vector<128x384xbf16>
    %cst = arith.constant dense<0.000000e+00> : vector<16x384xf32>
    %3 = tpu.matmul %1, %2, %cst {dimension_numbers = #tpu.dot_dimension_numbers<[1], [0], [0], [1], [0, 0, 1, 1], [], []>} : vector<16x128xbf16>, vector<128x384xbf16>, vector<16x384xf32> -> vector<16x384xf32>
    %4 = tpu.iota {dimensions = array<i32: 0>} : vector<8x8xi32>
    %5 = tpu.iota {dimensions = array<i32: 1>} : vector<8x8xi32>
    %6 = arith.cmpi sge, %4, %5 : vector<8x8xi32>
    %7 = vector.shape_cast %6 : vector<8x8xi1> to vector<1x8x8xi1>
    %cst_4 = arith.constant 0.000000e+00 : f32
    %8 = vector.broadcast %cst_4 : f32 to vector<16x128xf32>
    %9 = vector.extract_strided_slice %3 {offsets = [0, 0], sizes = [16, 32], strides = [1, 1]} : vector<16x384xf32> to vector<16x32xf32>
    %10 = vector.shape_cast %9 : vector<16x32xf32> to vector<2x8x32xf32>
    %11 = arith.truncf %10 : vector<2x8x32xf32> to vector<2x8x32xbf16>
    %12 = vector.extract_strided_slice %3 {offsets = [0, 128], sizes = [16, 32], strides = [1, 1]} : vector<16x384xf32> to vector<16x32xf32>
    %13 = vector.shape_cast %12 : vector<16x32xf32> to vector<2x8x32xf32>
    %14 = arith.truncf %13 : vector<2x8x32xf32> to vector<2x8x32xbf16>
    %15 = vector.extract_strided_slice %3 {offsets = [0, 256], sizes = [16, 32], strides = [1, 1]} : vector<16x384xf32> to vector<16x32xf32>
    %16 = vector.shape_cast %15 : vector<16x32xf32> to vector<2x8x32xf32>
    %17 = arith.truncf %16 : vector<2x8x32xf32> to vector<2x8x32xbf16>
    "tpu.trace_start"() <{level = 10 : i32, message = "bqd,bkd->bqk"}> : () -> ()
    %cst_5 = arith.constant dense<0.000000e+00> : vector<2x8x8xf32>
    %18 = tpu.matmul %11, %14, %cst_5 {dimension_numbers = #tpu.dot_dimension_numbers<[2], [2], [1], [1], [0, 0, 0, 1, 1, 1], [0], [0]>} : vector<2x8x32xbf16>, vector<2x8x32xbf16>, vector<2x8x8xf32> -> vector<2x8x8xf32>
    "tpu.trace_stop"() : () -> ()
    %cst_6 = arith.constant 0.176776692 : f32
    %19 = vector.broadcast %cst_6 : f32 to vector<2x8x8xf32>
    %20 = arith.mulf %18, %19 : vector<2x8x8xf32>
    %cst_7 = arith.constant -1.000000e+30 : f32
    %21 = vector.shape_cast %7 : vector<1x8x8xi1> to vector<1x8x8xi1>
    %22 = vector.broadcast %21 : vector<1x8x8xi1> to vector<2x8x8xi1>
    %23 = vector.broadcast %cst_7 : f32 to vector<2x8x8xf32>
    %24 = arith.select %22, %20, %23 : vector<2x8x8xi1>, vector<2x8x8xf32>
    %cst_8 = arith.constant dense<0xFF800000> : vector<2x8xf32>
    %25 = vector.multi_reduction <maximumf>, %24, %cst_8 [2] : vector<2x8x8xf32> to vector<2x8xf32>
    %26 = vector.shape_cast %25 : vector<2x8xf32> to vector<2x8x1xf32>
    %27 = vector.broadcast %26 : vector<2x8x1xf32> to vector<2x8x8xf32>
    %28 = arith.subf %24, %27 : vector<2x8x8xf32>
    %29 = math.exp %28 : vector<2x8x8xf32>
    %cst_9 = arith.constant dense<0.000000e+00> : vector<2x8xf32>
    %30 = vector.multi_reduction <add>, %29, %cst_9 [2] : vector<2x8x8xf32> to vector<2x8xf32>
    %31 = vector.shape_cast %30 : vector<2x8xf32> to vector<2x8x1xf32>
    %32 = tpu.reciprocal %31 {approx = true} : vector<2x8x1xf32> -> vector<2x8x1xf32>
    %33 = vector.broadcast %32 : vector<2x8x1xf32> to vector<2x8x8xf32>
    %34 = arith.mulf %29, %33 : vector<2x8x8xf32>
    %35 = arith.truncf %34 : vector<2x8x8xf32> to vector<2x8x8xbf16>
    "tpu.trace_start"() <{level = 10 : i32, message = "bqk,bkd->bqd"}> : () -> ()
    %cst_10 = arith.constant dense<0.000000e+00> : vector<2x8x32xf32>
    %36 = tpu.matmul %35, %17, %cst_10 {dimension_numbers = #tpu.dot_dimension_numbers<[2], [1], [1], [2], [0, 0, 0, 1, 1, 2], [0], [0]>} : vector<2x8x8xbf16>, vector<2x8x32xbf16>, vector<2x8x32xf32> -> vector<2x8x32xf32>
    "tpu.trace_stop"() : () -> ()
    %37 = vector.shape_cast %36 : vector<2x8x32xf32> to vector<16x32xf32>
    %38 = arith.truncf %37 : vector<16x32xf32> to vector<16x32xbf16>
    %c0_11 = arith.constant 0 : index
    %c0_12 = arith.constant 0 : index
    %c0_13 = arith.constant 0 : index
    %39 = vector.load %arg3[%c0_11, %c0_12, %c0_13] : memref<4x32x128xbf16, #tpu.memory_space<vmem>>, vector<1x32x128xbf16>
    %40 = vector.shape_cast %39 : vector<1x32x128xbf16> to vector<32x128xbf16>
    %cst_14 = arith.constant dense<0.000000e+00> : vector<16x128xf32>
    %41 = tpu.matmul %38, %40, %cst_14 {dimension_numbers = #tpu.dot_dimension_numbers<[1], [0], [0], [1], [0, 0, 1, 1], [], []>} : vector<16x32xbf16>, vector<32x128xbf16>, vector<16x128xf32> -> vector<16x128xf32>
    %42 = arith.addf %8, %41 : vector<16x128xf32>
    %43 = vector.extract_strided_slice %3 {offsets = [0, 32], sizes = [16, 32], strides = [1, 1]} : vector<16x384xf32> to vector<16x32xf32>
    %44 = vector.shape_cast %43 : vector<16x32xf32> to vector<2x8x32xf32>
    %45 = arith.truncf %44 : vector<2x8x32xf32> to vector<2x8x32xbf16>
    %46 = vector.extract_strided_slice %3 {offsets = [0, 160], sizes = [16, 32], strides = [1, 1]} : vector<16x384xf32> to vector<16x32xf32>
    %47 = vector.shape_cast %46 : vector<16x32xf32> to vector<2x8x32xf32>
    %48 = arith.truncf %47 : vector<2x8x32xf32> to vector<2x8x32xbf16>
    %49 = vector.extract_strided_slice %3 {offsets = [0, 288], sizes = [16, 32], strides = [1, 1]} : vector<16x384xf32> to vector<16x32xf32>
    %50 = vector.shape_cast %49 : vector<16x32xf32> to vector<2x8x32xf32>
    %51 = arith.truncf %50 : vector<2x8x32xf32> to vector<2x8x32xbf16>
    "tpu.trace_start"() <{level = 10 : i32, message = "bqd,bkd->bqk"}> : () -> ()
    %cst_15 = arith.constant dense<0.000000e+00> : vector<2x8x8xf32>
    %52 = tpu.matmul %45, %48, %cst_15 {dimension_numbers = #tpu.dot_dimension_numbers<[2], [2], [1], [1], [0, 0, 0, 1, 1, 1], [0], [0]>} : vector<2x8x32xbf16>, vector<2x8x32xbf16>, vector<2x8x8xf32> -> vector<2x8x8xf32>
    "tpu.trace_stop"() : () -> ()
    %cst_16 = arith.constant 0.176776692 : f32
    %53 = vector.broadcast %cst_16 : f32 to vector<2x8x8xf32>
    %54 = arith.mulf %52, %53 : vector<2x8x8xf32>
    %cst_17 = arith.constant -1.000000e+30 : f32
    %55 = vector.shape_cast %7 : vector<1x8x8xi1> to vector<1x8x8xi1>
    %56 = vector.broadcast %55 : vector<1x8x8xi1> to vector<2x8x8xi1>
    %57 = vector.broadcast %cst_17 : f32 to vector<2x8x8xf32>
    %58 = arith.select %56, %54, %57 : vector<2x8x8xi1>, vector<2x8x8xf32>
    %cst_18 = arith.constant dense<0xFF800000> : vector<2x8xf32>
    %59 = vector.multi_reduction <maximumf>, %58, %cst_18 [2] : vector<2x8x8xf32> to vector<2x8xf32>
    %60 = vector.shape_cast %59 : vector<2x8xf32> to vector<2x8x1xf32>
    %61 = vector.broadcast %60 : vector<2x8x1xf32> to vector<2x8x8xf32>
    %62 = arith.subf %58, %61 : vector<2x8x8xf32>
    %63 = math.exp %62 : vector<2x8x8xf32>
    %cst_19 = arith.constant dense<0.000000e+00> : vector<2x8xf32>
    %64 = vector.multi_reduction <add>, %63, %cst_19 [2] : vector<2x8x8xf32> to vector<2x8xf32>
    %65 = vector.shape_cast %64 : vector<2x8xf32> to vector<2x8x1xf32>
    %66 = tpu.reciprocal %65 {approx = true} : vector<2x8x1xf32> -> vector<2x8x1xf32>
    %67 = vector.broadcast %66 : vector<2x8x1xf32> to vector<2x8x8xf32>
    %68 = arith.mulf %63, %67 : vector<2x8x8xf32>
    %69 = arith.truncf %68 : vector<2x8x8xf32> to vector<2x8x8xbf16>
    "tpu.trace_start"() <{level = 10 : i32, message = "bqk,bkd->bqd"}> : () -> ()
    %cst_20 = arith.constant dense<0.000000e+00> : vector<2x8x32xf32>
    %70 = tpu.matmul %69, %51, %cst_20 {dimension_numbers = #tpu.dot_dimension_numbers<[2], [1], [1], [2], [0, 0, 0, 1, 1, 2], [0], [0]>} : vector<2x8x8xbf16>, vector<2x8x32xbf16>, vector<2x8x32xf32> -> vector<2x8x32xf32>
    "tpu.trace_stop"() : () -> ()
    %71 = vector.shape_cast %70 : vector<2x8x32xf32> to vector<16x32xf32>
    %72 = arith.truncf %71 : vector<16x32xf32> to vector<16x32xbf16>
    %c1 = arith.constant 1 : index
    %c0_21 = arith.constant 0 : index
    %c0_22 = arith.constant 0 : index
    %73 = vector.load %arg3[%c1, %c0_21, %c0_22] : memref<4x32x128xbf16, #tpu.memory_space<vmem>>, vector<1x32x128xbf16>
    %74 = vector.shape_cast %73 : vector<1x32x128xbf16> to vector<32x128xbf16>
    %cst_23 = arith.constant dense<0.000000e+00> : vector<16x128xf32>
    %75 = tpu.matmul %72, %74, %cst_23 {dimension_numbers = #tpu.dot_dimension_numbers<[1], [0], [0], [1], [0, 0, 1, 1], [], []>} : vector<16x32xbf16>, vector<32x128xbf16>, vector<16x128xf32> -> vector<16x128xf32>
    %76 = arith.addf %42, %75 : vector<16x128xf32>
    %77 = vector.extract_strided_slice %3 {offsets = [0, 64], sizes = [16, 32], strides = [1, 1]} : vector<16x384xf32> to vector<16x32xf32>
    %78 = vector.shape_cast %77 : vector<16x32xf32> to vector<2x8x32xf32>
    %79 = arith.truncf %78 : vector<2x8x32xf32> to vector<2x8x32xbf16>
    %80 = vector.extract_strided_slice %3 {offsets = [0, 192], sizes = [16, 32], strides = [1, 1]} : vector<16x384xf32> to vector<16x32xf32>
    %81 = vector.shape_cast %80 : vector<16x32xf32> to vector<2x8x32xf32>
    %82 = arith.truncf %81 : vector<2x8x32xf32> to vector<2x8x32xbf16>
    %83 = vector.extract_strided_slice %3 {offsets = [0, 320], sizes = [16, 32], strides = [1, 1]} : vector<16x384xf32> to vector<16x32xf32>
    %84 = vector.shape_cast %83 : vector<16x32xf32> to vector<2x8x32xf32>
    %85 = arith.truncf %84 : vector<2x8x32xf32> to vector<2x8x32xbf16>
    "tpu.trace_start"() <{level = 10 : i32, message = "bqd,bkd->bqk"}> : () -> ()
    %cst_24 = arith.constant dense<0.000000e+00> : vector<2x8x8xf32>
    %86 = tpu.matmul %79, %82, %cst_24 {dimension_numbers = #tpu.dot_dimension_numbers<[2], [2], [1], [1], [0, 0, 0, 1, 1, 1], [0], [0]>} : vector<2x8x32xbf16>, vector<2x8x32xbf16>, vector<2x8x8xf32> -> vector<2x8x8xf32>
    "tpu.trace_stop"() : () -> ()
    %cst_25 = arith.constant 0.176776692 : f32
    %87 = vector.broadcast %cst_25 : f32 to vector<2x8x8xf32>
    %88 = arith.mulf %86, %87 : vector<2x8x8xf32>
    %cst_26 = arith.constant -1.000000e+30 : f32
    %89 = vector.shape_cast %7 : vector<1x8x8xi1> to vector<1x8x8xi1>
    %90 = vector.broadcast %89 : vector<1x8x8xi1> to vector<2x8x8xi1>
    %91 = vector.broadcast %cst_26 : f32 to vector<2x8x8xf32>
    %92 = arith.select %90, %88, %91 : vector<2x8x8xi1>, vector<2x8x8xf32>
    %cst_27 = arith.constant dense<0xFF800000> : vector<2x8xf32>
    %93 = vector.multi_reduction <maximumf>, %92, %cst_27 [2] : vector<2x8x8xf32> to vector<2x8xf32>
    %94 = vector.shape_cast %93 : vector<2x8xf32> to vector<2x8x1xf32>
    %95 = vector.broadcast %94 : vector<2x8x1xf32> to vector<2x8x8xf32>
    %96 = arith.subf %92, %95 : vector<2x8x8xf32>
    %97 = math.exp %96 : vector<2x8x8xf32>
    %cst_28 = arith.constant dense<0.000000e+00> : vector<2x8xf32>
    %98 = vector.multi_reduction <add>, %97, %cst_28 [2] : vector<2x8x8xf32> to vector<2x8xf32>
    %99 = vector.shape_cast %98 : vector<2x8xf32> to vector<2x8x1xf32>
    %100 = tpu.reciprocal %99 {approx = true} : vector<2x8x1xf32> -> vector<2x8x1xf32>
    %101 = vector.broadcast %100 : vector<2x8x1xf32> to vector<2x8x8xf32>
    %102 = arith.mulf %97, %101 : vector<2x8x8xf32>
    %103 = arith.truncf %102 : vector<2x8x8xf32> to vector<2x8x8xbf16>
    "tpu.trace_start"() <{level = 10 : i32, message = "bqk,bkd->bqd"}> : () -> ()
    %cst_29 = arith.constant dense<0.000000e+00> : vector<2x8x32xf32>
    %104 = tpu.matmul %103, %85, %cst_29 {dimension_numbers = #tpu.dot_dimension_numbers<[2], [1], [1], [2], [0, 0, 0, 1, 1, 2], [0], [0]>} : vector<2x8x8xbf16>, vector<2x8x32xbf16>, vector<2x8x32xf32> -> vector<2x8x32xf32>
    "tpu.trace_stop"() : () -> ()
    %105 = vector.shape_cast %104 : vector<2x8x32xf32> to vector<16x32xf32>
    %106 = arith.truncf %105 : vector<16x32xf32> to vector<16x32xbf16>
    %c2 = arith.constant 2 : index
    %c0_30 = arith.constant 0 : index
    %c0_31 = arith.constant 0 : index
    %107 = vector.load %arg3[%c2, %c0_30, %c0_31] : memref<4x32x128xbf16, #tpu.memory_space<vmem>>, vector<1x32x128xbf16>
    %108 = vector.shape_cast %107 : vector<1x32x128xbf16> to vector<32x128xbf16>
    %cst_32 = arith.constant dense<0.000000e+00> : vector<16x128xf32>
    %109 = tpu.matmul %106, %108, %cst_32 {dimension_numbers = #tpu.dot_dimension_numbers<[1], [0], [0], [1], [0, 0, 1, 1], [], []>} : vector<16x32xbf16>, vector<32x128xbf16>, vector<16x128xf32> -> vector<16x128xf32>
    %110 = arith.addf %76, %109 : vector<16x128xf32>
    %111 = vector.extract_strided_slice %3 {offsets = [0, 96], sizes = [16, 32], strides = [1, 1]} : vector<16x384xf32> to vector<16x32xf32>
    %112 = vector.shape_cast %111 : vector<16x32xf32> to vector<2x8x32xf32>
    %113 = arith.truncf %112 : vector<2x8x32xf32> to vector<2x8x32xbf16>
    %114 = vector.extract_strided_slice %3 {offsets = [0, 224], sizes = [16, 32], strides = [1, 1]} : vector<16x384xf32> to vector<16x32xf32>
    %115 = vector.shape_cast %114 : vector<16x32xf32> to vector<2x8x32xf32>
    %116 = arith.truncf %115 : vector<2x8x32xf32> to vector<2x8x32xbf16>
    %117 = vector.extract_strided_slice %3 {offsets = [0, 352], sizes = [16, 32], strides = [1, 1]} : vector<16x384xf32> to vector<16x32xf32>
    %118 = vector.shape_cast %117 : vector<16x32xf32> to vector<2x8x32xf32>
    %119 = arith.truncf %118 : vector<2x8x32xf32> to vector<2x8x32xbf16>
    "tpu.trace_start"() <{level = 10 : i32, message = "bqd,bkd->bqk"}> : () -> ()
    %cst_33 = arith.constant dense<0.000000e+00> : vector<2x8x8xf32>
    %120 = tpu.matmul %113, %116, %cst_33 {dimension_numbers = #tpu.dot_dimension_numbers<[2], [2], [1], [1], [0, 0, 0, 1, 1, 1], [0], [0]>} : vector<2x8x32xbf16>, vector<2x8x32xbf16>, vector<2x8x8xf32> -> vector<2x8x8xf32>
    "tpu.trace_stop"() : () -> ()
    %cst_34 = arith.constant 0.176776692 : f32
    %121 = vector.broadcast %cst_34 : f32 to vector<2x8x8xf32>
    %122 = arith.mulf %120, %121 : vector<2x8x8xf32>
    %cst_35 = arith.constant -1.000000e+30 : f32
    %123 = vector.shape_cast %7 : vector<1x8x8xi1> to vector<1x8x8xi1>
    %124 = vector.broadcast %123 : vector<1x8x8xi1> to vector<2x8x8xi1>
    %125 = vector.broadcast %cst_35 : f32 to vector<2x8x8xf32>
    %126 = arith.select %124, %122, %125 : vector<2x8x8xi1>, vector<2x8x8xf32>
    %cst_36 = arith.constant dense<0xFF800000> : vector<2x8xf32>
    %127 = vector.multi_reduction <maximumf>, %126, %cst_36 [2] : vector<2x8x8xf32> to vector<2x8xf32>
    %128 = vector.shape_cast %127 : vector<2x8xf32> to vector<2x8x1xf32>
    %129 = vector.broadcast %128 : vector<2x8x1xf32> to vector<2x8x8xf32>
    %130 = arith.subf %126, %129 : vector<2x8x8xf32>
    %131 = math.exp %130 : vector<2x8x8xf32>
    %cst_37 = arith.constant dense<0.000000e+00> : vector<2x8xf32>
    %132 = vector.multi_reduction <add>, %131, %cst_37 [2] : vector<2x8x8xf32> to vector<2x8xf32>
    %133 = vector.shape_cast %132 : vector<2x8xf32> to vector<2x8x1xf32>
    %134 = tpu.reciprocal %133 {approx = true} : vector<2x8x1xf32> -> vector<2x8x1xf32>
    %135 = vector.broadcast %134 : vector<2x8x1xf32> to vector<2x8x8xf32>
    %136 = arith.mulf %131, %135 : vector<2x8x8xf32>
    %137 = arith.truncf %136 : vector<2x8x8xf32> to vector<2x8x8xbf16>
    "tpu.trace_start"() <{level = 10 : i32, message = "bqk,bkd->bqd"}> : () -> ()
    %cst_38 = arith.constant dense<0.000000e+00> : vector<2x8x32xf32>
    %138 = tpu.matmul %137, %119, %cst_38 {dimension_numbers = #tpu.dot_dimension_numbers<[2], [1], [1], [2], [0, 0, 0, 1, 1, 2], [0], [0]>} : vector<2x8x8xbf16>, vector<2x8x32xbf16>, vector<2x8x32xf32> -> vector<2x8x32xf32>
    "tpu.trace_stop"() : () -> ()
    %139 = vector.shape_cast %138 : vector<2x8x32xf32> to vector<16x32xf32>
    %140 = arith.truncf %139 : vector<16x32xf32> to vector<16x32xbf16>
    %c3 = arith.constant 3 : index
    %c0_39 = arith.constant 0 : index
    %c0_40 = arith.constant 0 : index
    %141 = vector.load %arg3[%c3, %c0_39, %c0_40] : memref<4x32x128xbf16, #tpu.memory_space<vmem>>, vector<1x32x128xbf16>
    %142 = vector.shape_cast %141 : vector<1x32x128xbf16> to vector<32x128xbf16>
    %cst_41 = arith.constant dense<0.000000e+00> : vector<16x128xf32>
    %143 = tpu.matmul %140, %142, %cst_41 {dimension_numbers = #tpu.dot_dimension_numbers<[1], [0], [0], [1], [0, 0, 1, 1], [], []>} : vector<16x32xbf16>, vector<32x128xbf16>, vector<16x128xf32> -> vector<16x128xf32>
    %144 = arith.addf %110, %143 : vector<16x128xf32>
    %c0_42 = arith.constant 0 : index
    %c0_43 = arith.constant 0 : index
    %145 = vector.load %arg4[%c0_42, %c0_43] : memref<1x128xf32, #tpu.memory_space<vmem>>, vector<1x128xf32>
    %146 = vector.broadcast %145 : vector<1x128xf32> to vector<16x128xf32>
    %147 = arith.addf %144, %146 : vector<16x128xf32>
    %148 = vector.shape_cast %147 : vector<16x128xf32> to vector<2x8x128xf32>
    %c0_44 = arith.constant 0 : index
    %c0_45 = arith.constant 0 : index
    %c0_46 = arith.constant 0 : index
    %149 = vector.load %arg5[%c0_44, %c0_45, %c0_46] : memref<2x8x128xf32, #tpu.memory_space<vmem>>, vector<2x8x128xf32>
    tpu.vector_store %arg5[%c0_44, %c0_45, %c0_46], %148 {strides = array<i32>} : memref<2x8x128xf32, #tpu.memory_space<vmem>>, vector<2x8x128xf32>,
    return
  }
  func.func @transform_0(%arg0: i32) -> (i32, i32, i32) {
    %c0_i32 = arith.constant 0 : i32
    %c0_i32_0 = arith.constant 0 : i32
    %c0_i32_1 = arith.constant 0 : i32
    return %arg0, %c0_i32, %c0_i32_0 : i32, i32, i32
  }
  func.func @transform_1(%arg0: i32) -> (i32, i32) {
    %c0_i32 = arith.constant 0 : i32
    %c0_i32_0 = arith.constant 0 : i32
    %c0_i32_1 = arith.constant 0 : i32
    return %c0_i32, %c0_i32_0 : i32, i32
  }
  func.func @transform_2(%arg0: i32) -> (i32, i32, i32) {
    %c0_i32 = arith.constant 0 : i32
    %c0_i32_0 = arith.constant 0 : i32
    %c0_i32_1 = arith.constant 0 : i32
    %c0_i32_2 = arith.constant 0 : i32
    return %c0_i32, %c0_i32_0, %c0_i32_1 : i32, i32, i32
  }
  func.func @transform_3(%arg0: i32) -> (i32, i32) {
    %c0_i32 = arith.constant 0 : i32
    %c0_i32_0 = arith.constant 0 : i32
    %c0_i32_1 = arith.constant 0 : i32
    return %c0_i32, %c0_i32_0 : i32, i32
  }
  func.func @transform_4(%arg0: i32) -> (i32, i32, i32) {
    %c0_i32 = arith.constant 0 : i32
    %c0_i32_0 = arith.constant 0 : i32
    %c0_i32_1 = arith.constant 0 : i32
    return %arg0, %c0_i32, %c0_i32_0 : i32, i32, i32
  }
}

</mosaic_0001>

<bundles_post_ra>
// kernel: tpu_custom_call.1
= control target key start
LH: loop header
LB: loop body
LE: loop exit
PB: predicated region body
PF: predicated region fallthrough
CT: control target
= control target key end

     0   :  { %9 = vsyncpa [#allocation3], 0  ;;  %s2245_s0 = inlined_call_operand.hbm [shape: bf16[2,8,128], index: 0, kind: input, shape index: {}]   ;;  %s2246_s1 = inlined_call_operand.hbm [shape: bf16[128,384], index: 1, kind: input, shape index: {}]   ;;  %s2247_s2 = inlined_call_operand.hbm [shape: bf16[4,32,128], index: 2, kind: input, shape index: {}]   ;;  %s2248_s3 = inlined_call_operand.vmem [shape: f32[1,128], index: 3, kind: input, shape index: {}]   ;;  %s2249_s4 = inlined_call_operand.hbm [shape: f32[2,8,128], index: 4, kind: output, shape index: {}]  }
   0x1   :  { %10 = vsyncpa [#allocation6], 0 }
   0x2   :  { %11 = vsyncpa [#allocation4], 0  ;;  %s1935_s15 = smov [#allocation5]   ;;  %s1841_s19 = scalar_lea.hbm %s2246_s1, 3072 }
   0x3   :  { %s29_s16 = sshll.u32 %s1935_s15, 4  ;;  %p1842_p0 = scmp.ne.s32.totalorder %s2246_s1, %s1841_s19  ;;  %s30_s16 = int_to_ptr.vmem [resolvable:$true] %s29_s16 }
   0x4   :  { %p1845_p1 = scmp.lt.u32.totalorder %s1841_s19, %s2246_s1 }
   0x6   :  { %p1847_p2 = pnand %p1845_p1, %p1842_p0 }
   0x8   :  { %1850 = shalt.err (!%p1847_p2)
}
   0x9   :  { %s1851_s24 = scalar_lea.vmem %s30_s16, 3072  ;;  %p1856_p4 = scmp.lt.s32.totalorder %s30_s16, %s30_s16 }
   0xa   :  { %p1852_p3 = scmp.ne.s32.totalorder %s30_s16, %s1851_s24  ;;  %p1857_p5 = scmp.lt.s32.totalorder %s1851_s24, %s1851_s24 }
   0xc   :  { %p1858_p6 = por %p1857_p5, %p1856_p4 }
   0xe   :  { %p1859_p7 = pnand %p1858_p6, %p1852_p3 }
  0x10   :  { %1862 = shalt.err (!%p1859_p7)
}
  0x11   :  { %s1936_s25 = smov 192   ;;  %s1937_s26 = smov 12  }
  0x12   :  { %35 = dma.hbm_to_vmem [thread:$0]  %s2246_s1, 3072, %s30_s16, [#allocation6], %s1936_s25, %s1936_s25, %s1937_s26  }
  0x13   :  { %s1938_s29 = smov [#allocation2]   ;;  %s1863_s7 = scalar_lea.hbm %s2245_s0, 128 }
  0x14   :  { %s17_s30 = sshll.u32 %s1938_s29, 4  ;;  %p1864_p8 = scmp.ne.s32.totalorder %s2245_s0, %s1863_s7  ;;  %s18_s30 = int_to_ptr.vmem [resolvable:$true] %s17_s30 }
  0x15   :  { %p1867_p9 = scmp.lt.u32.totalorder %s1863_s7, %s2245_s0 }
  0x17   :  { %p1869_p10 = pnand %p1867_p9, %p1864_p8 }
  0x19   :  { %1872 = shalt.err (!%p1869_p10)
}
  0x1a   :  { %s1873_s12 = scalar_lea.vmem %s18_s30, 128  ;;  %p1878_p12 = scmp.lt.s32.totalorder %s18_s30, %s18_s30 }
  0x1b   :  { %p1874_p11 = scmp.ne.s32.totalorder %s18_s30, %s1873_s12  ;;  %p1879_p13 = scmp.lt.s32.totalorder %s1873_s12, %s1873_s12 }
  0x1d   :  { %p1880_p0 = por %p1879_p13, %p1878_p12 }
  0x1f   :  { %p1881_p1 = pnand %p1880_p0, %p1874_p11 }
  0x21   :  { %1884 = shalt.err (!%p1881_p1)
}
  0x22   :  { %s1939_s1 = smov 64   ;;  %s1940_s13 = smov 4  }
  0x23   :  { %23 = dma.hbm_to_vmem [thread:$0]  %s2245_s0, 128, %s18_s30, [#allocation3], %s1939_s1, %s1939_s1, %s1940_s13  }
  0x24   :  { %s1941_s16 = smov [#allocation7]   ;;  %s1885_s20 = scalar_lea.hbm %s2247_s2, 1024 }
  0x25   :  { %s41_s17 = sshll.u32 %s1941_s16, 4  ;;  %p1886_p2 = scmp.ne.s32.totalorder %s2247_s2, %s1885_s20  ;;  %s42_s17 = int_to_ptr.vmem [resolvable:$true] %s41_s17 }
  0x26   :  { %p1889_p3 = scmp.lt.u32.totalorder %s1885_s20, %s2247_s2 }
  0x28   :  { %p1891_p4 = pnand %p1889_p3, %p1886_p2 }
  0x2a   :  { %1894 = shalt.err (!%p1891_p4)
}
  0x2b   :  { %s1895_s25 = scalar_lea.vmem %s42_s17, 1024  ;;  %p1900_p6 = scmp.lt.s32.totalorder %s42_s17, %s42_s17 }
  0x2c   :  { %p1896_p5 = scmp.ne.s32.totalorder %s42_s17, %s1895_s25  ;;  %p1901_p7 = scmp.lt.s32.totalorder %s1895_s25, %s1895_s25 }
  0x2e   :  { %p1902_p8 = por %p1901_p7, %p1900_p6 }
  0x30   :  { %p1903_p9 = pnand %p1902_p8, %p1896_p5 }
  0x32   :  { %1906 = shalt.err (!%p1903_p9)
}
  0x33   :  { %47 = dma.hbm_to_vmem [thread:$0]  %s2247_s2, 1024, %s42_s17, [#allocation6], %s1939_s1, %s1939_s1, %s1940_s13  }
  0x34   :  { %1929 = dma.done.wait [#allocation3], 128  }
  0x35   :  { %1930 = vsyncadd [#allocation3], 4294967168 }
  0x36   :  { %1931 = dma.done.wait [#allocation6], 4096  }
  0x37   :  { %1932 = vsyncadd [#allocation6], 4294963200  ;;  %v1942_v0 = vmov 0   ;;  %v1943_v1 = vmov 0.0   ;;  %v1768_v2 = vld [vmem:[#allocation5 + $0x4] ss:$12 sps:$4 sm:$0xff]   ;;  %v312_v45 = vlaneseq }
  0x38   :  { %260 = vmatprep.mubr.bf16.mxu0 %v1942_v0  ;;  %1605 = vmatprep.subr.bf16.mxu1 %v1943_v1  ;;  %v1770_v3 = vld [vmem:[#allocation5] ss:$12 sps:$4 sm:$0xff]   ;;  %v1771_v4 = vld [vmem:[#allocation5 + $0x1c] ss:$12 sps:$4 sm:$0xff]   ;;  %v1773_v5 = vld [vmem:[#allocation5 + $0x18] ss:$12 sps:$4 sm:$0xff]  }
  0x39   :  { %228 = vmatprep.subr.bf16.mxu0 %v1768_v2  ;;  %v1774_v6 = vld [vmem:[#allocation5 + $0x34] ss:$12 sps:$4 sm:$0xff]   ;;  %v1776_v7 = vld [vmem:[#allocation5 + $0x30] ss:$12 sps:$4 sm:$0xff]   ;;  %v1777_v8 = vld [vmem:[#allocation5 + $0x4c] ss:$12 sps:$4 sm:$0xff]  }
  0x3a   :  { %229 = vmatpush1.bf16.msra.mxu0 %v1770_v3  ;;  %v1779_v9 = vld [vmem:[#allocation5 + $0x48] ss:$12 sps:$4 sm:$0xff]   ;;  %v1780_v10 = vld [vmem:[#allocation5 + $0x64] ss:$12 sps:$4 sm:$0xff]   ;;  %v1794_v12 = vld [vmem:[#allocation5 + $0x20] ss:$12 sps:$4 sm:$0xff]  }
  0x3b   :  { %230 = vmatprep.subr.bf16.mxu0 %v1771_v4  ;;  %v1793_v11 = vld [vmem:[#allocation5 + $0x8] ss:$12 sps:$4 sm:$0xff]   ;;  %v1782_v13 = vld [vmem:[#allocation5 + $0x60] ss:$12 sps:$4 sm:$0xff]   ;;  %v1785_v15 = vld [vmem:[#allocation5 + $0x78] ss:$12 sps:$4 sm:$0xff]  }
  0x3c   :  { %1606 = vmatpush3.bf16.msra.mxu1 %v1793_v11  ;;  %v1783_v14 = vld [vmem:[#allocation5 + $0x7c] ss:$12 sps:$4 sm:$0xff]   ;;  %v1795_v16 = vld [vmem:[#allocation5 + $0x38] ss:$12 sps:$4 sm:$0xff]   ;;  %v1786_v17 = vld [vmem:[#allocation5 + $0x94] ss:$12 sps:$4 sm:$0xff]  }
  0x3d   :  { %1607 = vmatprep.subr.bf16.mxu1 %v1943_v1  ;;  %v1796_v18 = vld [vmem:[#allocation5 + $0x50] ss:$12 sps:$4 sm:$0xff]   ;;  %v1789_v20 = vld [vmem:[#allocation5 + $0xac] ss:$12 sps:$4 sm:$0xff]   ;;  %v1797_v21 = vld [vmem:[#allocation5 + $0x68] ss:$12 sps:$4 sm:$0xff]  }
  0x3e   :  { %231 = vmatpush1.bf16.msra.mxu0 %v1773_v5  ;;  %v1788_v19 = vld [vmem:[#allocation5 + $0x90] ss:$12 sps:$4 sm:$0xff]   ;;  %v1791_v22 = vld [vmem:[#allocation5 + $0xa8] ss:$12 sps:$4 sm:$0xff]   ;;  %v1798_v24 = vld [vmem:[#allocation5 + $0x80] ss:$12 sps:$4 sm:$0xff]  }
  0x3f   :  { %232 = vmatprep.subr.bf16.mxu0 %v1774_v6  ;;  %v1792_v23 = vld [vmem:[#allocation2] sm:$0xff]   ;;  %vm1944_vm0 = vmmov 0   ;;  %vm323_vm1 = vcmask 261120   ;;  %s1945_s2 = smov 96   ;;  %vm450_vm2 = vcmask 1043456   ;;  %v313_v46 = vshrl.u32 %v312_v45, 7 }
  0x40   :  { %1608 = vmatpush3.bf16.msra.mxu1 %v1794_v12  ;;  %v1799_v25 = vld [vmem:[#allocation5 + $0x98] ss:$12 sps:$4 sm:$0xff]   ;;  %v1800_v26 = vld [vmem:[#allocation5 + $0xb0] ss:$12 sps:$4 sm:$0xff]   ;;  %1621 = vmatprep.mubr.msk.bf16.mxu1 %vm1944_vm0, %v1943_v1  ;;  %v315_v47 = vand.u32 127, %v312_v45  ;;  %vm422_vm4 = vcmask 64512  }
  0x41   :  { %1609 = vmatprep.subr.bf16.mxu1 %v1943_v1  ;;  %s1946_s27 = smov 32   ;;  %s1947_s30 = smov [#allocation8]  }
  0x42   :  { %233 = vmatpush1.bf16.msra.mxu0 %v1776_v7  ;;  %vm2065_vm3 = vcmp.ge.s32.totalorder %v313_v46, %v315_v47  ;;  %s1485_s5 = sshll.u32 %s1947_s30, 4  ;;  %s1486_s5 = int_to_ptr.vmem [resolvable:$true] %s1485_s5 }
  0x43   :  { %234 = vmatprep.subr.bf16.mxu0 %v1777_v8  ;;  %s1907_s6 = scalar_lea.vmem %s1486_s5, 256  ;;  %p1912_p11 = scmp.lt.s32.totalorder %s1486_s5, %s1486_s5 }
  0x44   :  { %1610 = vmatpush3.bf16.msra.mxu1 %v1795_v16  ;;  %p1908_p10 = scmp.ne.s32.totalorder %s1486_s5, %s1907_s6  ;;  %p1913_p12 = scmp.lt.s32.totalorder %s1907_s6, %s1907_s6 }
  0x45   :  { %1611 = vmatprep.subr.bf16.mxu1 %v1943_v1 }
  0x46   :  { %235 = vmatpush1.bf16.msra.mxu0 %v1779_v9  ;;  %p1914_p13 = por %p1913_p12, %p1912_p11 }
  0x47   :  { %236 = vmatprep.subr.bf16.mxu0 %v1780_v10 }
  0x48   :  { %1612 = vmatpush3.bf16.msra.mxu1 %v1796_v18  ;;  %p1915_p0 = pnand %p1914_p13, %p1908_p10 }
  0x49   :  { %1613 = vmatprep.subr.bf16.mxu1 %v1943_v1 }
  0x4a   :  { %237 = vmatpush1.bf16.msra.mxu0 %v1782_v13 }
  0x4b   :  { %238 = vmatprep.subr.bf16.mxu0 %v1783_v14 }
  0x4c   :  { %1614 = vmatpush3.bf16.msra.mxu1 %v1797_v21 }
  0x4d   :  { %1615 = vmatprep.subr.bf16.mxu1 %v1943_v1 }
  0x4e   :  { %239 = vmatpush1.bf16.msra.mxu0 %v1785_v15 }
  0x4f   :  { %240 = vmatprep.subr.bf16.mxu0 %v1786_v17 }
  0x50   :  { %1616 = vmatpush3.bf16.msra.mxu1 %v1798_v24 }
  0x51   :  { %1617 = vmatprep.subr.bf16.mxu1 %v1943_v1 }
  0x52   :  { %241 = vmatpush1.bf16.msra.mxu0 %v1788_v19 }
  0x53   :  { %242 = vmatprep.subr.bf16.mxu0 %v1789_v20 }
  0x54   :  { %1618 = vmatpush3.bf16.msra.mxu1 %v1799_v25 }
  0x55   :  { %1619 = vmatprep.subr.bf16.mxu1 %v1943_v1 }
  0x56   :  { %243 = vmatpush1.bf16.msra.mxu0 %v1791_v22 }
  0x57   :  { %1625 = vmatprep.subr.bf16.mxu0 %v1943_v1 }
  0x58   :  { %1620 = vmatpush3.bf16.msra.mxu1 %v1800_v26 }
  0x59   :  { %261 = vmatmul.mubr.bf16.vlgmr.msra.gmra.mrb[0].mxu0 %v1792_v23  ;;  %1631 = vmatprep.subr.bf16.mxu1 %v1943_v1 }
  0x5a   :  { %1627 = vmatprep.mubr.msk.bf16.mxu0 %vm1944_vm0, %v1943_v1 }
  0x5b   :  { %1622 = vmatmul.mubr.bf16.vlgmr.msra.gmra.mrb[0].mxu1 %v1792_v23 }
  0x5c   :  { %1633 = vmatprep.mubr.msk.bf16.mxu1 %vm1944_vm0, %v1943_v1 }
 0x12c   :  { %v262_v27 = vpop.f32.mrb[0].mxu0 }
 0x12d   :  { %v264_v28 = vpop.f32.mrb[1].mxu0  ;;  %v2043_v35 = vpack.c.bf16 %v262_v27, %v262_v27 }
 0x12e   :  { %v2031_v29 = vpack.c.bf16 %v264_v28, %v264_v28  ;;  %v266_v30 = vpop.f32.mrb[2].mxu0  ;;  %v305_v37 = vpop.f32.mrb[0].mxu1 }
 0x12f   :  { %v268_v31 = vpop.f32.mrb[3].mxu0  ;;  %v2045_v36 = vpack.c.bf16 %v266_v30, %v266_v30  ;;  %v1623_v38 = vpop.f32.mrb[1].mxu1  ;;  %v2055_v39 = vpack.c.bf16 %v305_v37, %v305_v37 }
 0x130   :  { %v2033_v32 = vpack.c.bf16 %v268_v31, %v268_v31  ;;  %v328_v33 = vsel %vm323_vm1, %v2031_v29, 0  ;;  %v308_v40 = vpop.f32.mrb[2].mxu1 }
 0x131   :  { %1626 = vmatpush3.bf16.xpose.msra.mxu0 %v328_v33  ;;  %v2057_v41 = vpack.c.bf16 %v308_v40, %v308_v40  ;;  %v1624_v42 = vpop.f32.mrb[3].mxu1  ;;  %v452_v43 = vsel %vm450_vm2, %v2055_v39, 0 }
 0x132   :  { %601 = vrot.lane.b32.xlu1 %v2033_v32, %s1945_s2  ;;  %v374_v34 = vsel %vm323_vm1, %v2033_v32, 0  ;;  %1637 = vmatprep.subr.bf16.mxu0 %v1943_v1 }
 0x133   :  { %1632 = vmatpush3.bf16.xpose.msra.mxu1 %v374_v34  ;;  %v498_v44 = vsel %vm450_vm2, %v2057_v41, 0 }
 0x134   :  { %1643 = vmatprep.subr.bf16.mxu1 %v1943_v1 }
 0x138   :  { %1628 = vmatmul.mubr.msk.bf16.vlgmr.msra.gmra.mrb[4].mxu0 %vm323_vm1, %v2043_v35 }
 0x139   :  { %1639 = vmatprep.mubr.msk.bf16.mxu0 %vm1944_vm0, %v1943_v1  ;;  %1638 = vmatpush3.bf16.msra.mxu0 %v452_v43 }
 0x13a   :  { %1634 = vmatmul.mubr.msk.bf16.vlgmr.msra.gmra.mrb[4].mxu1 %vm323_vm1, %v2045_v36  ;;  %1649 = vmatprep.subr.bf16.mxu0 %v1943_v1 }
 0x13b   :  { %1645 = vmatprep.mubr.msk.bf16.mxu1 %vm1944_vm0, %v1943_v1  ;;  %1644 = vmatpush3.bf16.msra.mxu1 %v498_v44 }
 0x13c   :  { %1655 = vmatprep.subr.bf16.mxu1 %v1943_v1 }
 0x1a4   :  { %v602_v10 = vpop.permute.xlu1 %601 }
 0x1a5   :  { %v607_v21 = vsel %vm323_vm1, %v602_v10, 0 }
 0x20b   :  { %v364_v48 = vpop.f32.mrb[4].mxu0 }
 0x20c   :  { %v416_v50 = vmul.f32 0.17677669, %v364_v48  ;;  %v1629_v51 = vpop.f32.mrb[5].mxu0 }
 0x20d   :  { %v367_v52 = vpop.f32.mrb[6].mxu0  ;;  %v410_v53 = vpop.f32.mrb[4].mxu1 }
 0x20e   :  { %v417_v54 = vmul.f32 0.17677669, %v410_v53  ;;  %v1630_v55 = vpop.f32.mrb[7].mxu0  ;;  %v1635_v56 = vpop.f32.mrb[5].mxu1  ;;  %v420_v57 = vsel %vm2065_vm3, %v416_v50, -1e+30 }
 0x20f   :  { %v413_v58 = vpop.f32.mrb[6].mxu1  ;;  %v423_v59 = vsel %vm422_vm4, %v420_v57, -inf }
 0x210   :  { %424 = vmax.xlane.f32.xlu0 %v423_v59  ;;  %v1636_v60 = vpop.f32.mrb[7].mxu1  ;;  %v421_v61 = vsel %vm2065_vm3, %v417_v54, -1e+30 }
 0x211   :  { %v426_v62 = vsel %vm422_vm4, %v421_v61, -inf }
 0x214   :  { %427 = vmax.xlane.f32.xlu0 %v426_v62 }
 0x22a   :  { %549 = vrot.lane.b32.xlu0 %v2031_v29, %s1945_s2 }
 0x29d   :  { %v425_v63 = vpop.xlane.xlu0 %424 }
 0x29e   :  { %v429_v0 = vsub.f32 %v420_v57, %v425_v63 }
 0x2a0   :  { %v431_v2 = vmul.f32 1.442695, %v429_v0 }
 0x2a1   :  { %v428_v3 = vpop.xlane.xlu0 %427 }
 0x2a2   :  { %1809 = vpow2.f32 %v431_v2  ;;  %v430_v4 = vsub.f32 %v421_v61, %v428_v3 }
 0x2a4   :  { %v433_v5 = vmul.f32 1.442695, %v430_v4 }
 0x2a5   :  { %v550_v15 = vpop.permute.xlu0 %549 }
 0x2a6   :  { %1811 = vpow2.f32 %v433_v5  ;;  %v555_v18 = vsel %vm323_vm1, %v550_v15, 0  ;;  %v1804_v15 = vld [vmem:[#allocation7 + $0x18] sm:$0xff]  }
 0x2ac   :  { %v1810_v6 = vpop.eup %1809 }
 0x2ad   :  { %v435_v7 = vsel %vm422_vm4, %v1810_v6, 0.0 }
 0x2ae   :  { %436 = vadd.xlane.f32.xlu1 %v435_v7 }
 0x2b0   :  { %v1812_v8 = vpop.eup %1811 }
 0x2b1   :  { %v438_v9 = vsel %vm422_vm4, %v1812_v8, 0.0 }
 0x2b2   :  { %439 = vadd.xlane.f32.xlu1 %v438_v9  ;;  %v1803_v9 = vld [vmem:[#allocation7 + $0x10] sm:$0xff]  }
 0x2c3   :  { %546 = vrot.lane.b32.xlu1 %v2043_v35, %s1945_s2 }
 0x2c7   :  { %598 = vrot.lane.b32.xlu1 %v2045_v36, %s1945_s2 }
 0x33b   :  { %v437_v11 = vpop.xlane.xlu1 %436 }
 0x33c   :  { %1813 = vrcp.f32 %v437_v11 }
 0x33f   :  { %v440_v12 = vpop.xlane.xlu1 %439 }
 0x340   :  { %1815 = vrcp.f32 %v440_v12 }
 0x343   :  { %v547_v22 = vpop.permute.xlu1 %546 }
 0x346   :  { %v1814_v13 = vpop.eup %1813 }
 0x347   :  { %v443_v14 = vmul.f32 %v1814_v13, %v1810_v6  ;;  %v599_v23 = vpop.permute.xlu1 %598  ;;  %v1801_v13 = vld [vmem:[#allocation7] sm:$0xff]  }
 0x349   :  { %v445_v16 = vpack.c.bf16 %v443_v14, %v443_v14 }
 0x34a   :  { %v1816_v17 = vpop.eup %1815 }
 0x34b   :  { %v444_v19 = vmul.f32 %v1816_v17, %v1812_v8  ;;  %1640 = vmatmul.mubr.msk.bf16.vlgmr.msra.gmra.mrb[8].mxu0 %vm422_vm4, %v445_v16  ;;  %v1802_v16 = vld [vmem:[#allocation7 + $0x8] sm:$0xff]  }
 0x34c   :  { %1650 = vmatpush3.bf16.xpose.msra.mxu0 %v555_v18  ;;  %1651 = vmatprep.mubr.msk.bf16.mxu0 %vm1944_vm0, %v1943_v1 }
 0x34d   :  { %v446_v20 = vpack.c.bf16 %v444_v19, %v444_v19  ;;  %1661 = vmatprep.subr.bf16.mxu0 %v1943_v1 }
 0x34f   :  { %1646 = vmatmul.mubr.msk.bf16.vlgmr.msra.gmra.mrb[8].mxu1 %vm422_vm4, %v446_v20 }
 0x350   :  { %1656 = vmatpush3.bf16.xpose.msra.mxu1 %v607_v21  ;;  %1657 = vmatprep.mubr.msk.bf16.mxu1 %vm1944_vm0, %v1943_v1 }
 0x351   :  { %1667 = vmatprep.subr.bf16.mxu1 %v1943_v1 }
 0x353   :  { %1652 = vmatmul.mubr.msk.bf16.vlgmr.msra.gmra.mrb[12].mxu0 %vm323_vm1, %v547_v22 }
 0x354   :  { %1663 = vmatprep.mubr.msk.bf16.mxu0 %vm1944_vm0, %v1943_v1 }
 0x357   :  { %1658 = vmatmul.mubr.msk.bf16.vlgmr.msra.gmra.mrb[12].mxu1 %vm323_vm1, %v599_v23 }
 0x358   :  { %1669 = vmatprep.mubr.msk.bf16.mxu1 %vm1944_vm0, %v1943_v1 }
 0x41e   :  { %v2099_v24 = vpop.f32.mrb[8].mxu0 }
 0x41f   :  { %v1641_v25 = vpop.f32.mrb[9].mxu0 }
 0x420   :  { %v491_v26 = vpop.f32.mrb[10].mxu0 }
 0x421   :  { %v1642_v27 = vpop.f32.mrb[11].mxu0 }
 0x422   :  { %v2101_v28 = vpop.f32.mrb[8].mxu1 }
 0x423   :  { %v540_v30 = vpack.c.bf16 %v2101_v28, %v2099_v24  ;;  %v1647_v31 = vpop.f32.mrb[9].mxu1 }
 0x424   :  { %v537_v33 = vpop.f32.mrb[10].mxu1 }
 0x425   :  { %v1648_v34 = vpop.f32.mrb[11].mxu1 }
 0x426   :  { %v591_v37 = vpop.f32.mrb[12].mxu0 }
 0x427   :  { %v649_v38 = vmul.f32 0.17677669, %v591_v37  ;;  %v1653_v40 = vpop.f32.mrb[13].mxu0 }
 0x428   :  { %v594_v42 = vpop.f32.mrb[14].mxu0 }
 0x429   :  { %v1654_v43 = vpop.f32.mrb[15].mxu0  ;;  %v651_v44 = vsel %vm2065_vm3, %v649_v38, -1e+30 }
 0x42a   :  { %v643_v45 = vpop.f32.mrb[12].mxu1  ;;  %v653_v46 = vsel %vm422_vm4, %v651_v44, -inf }
 0x42b   :  { %v650_v47 = vmul.f32 0.17677669, %v643_v45  ;;  %654 = vmax.xlane.f32.xlu0 %v653_v46  ;;  %v1659_v48 = vpop.f32.mrb[13].mxu1 }
 0x42c   :  { %v646_v50 = vpop.f32.mrb[14].mxu1 }
 0x42d   :  { %v1660_v51 = vpop.f32.mrb[15].mxu1  ;;  %v652_v52 = vsel %vm2065_vm3, %v650_v47, -1e+30 }
 0x42e   :  { %v656_v53 = vsel %vm422_vm4, %v652_v52, -inf }
 0x42f   :  { %657 = vmax.xlane.f32.xlu1 %v656_v53 }
 0x440   :  { %727 = vrot.lane.b32.xlu1 %v2057_v41, %s1945_s2 }
 0x444   :  { %895 = vrot.lane.b32.xlu1 %v2031_v29, %s1939_s1 }
 0x448   :  { %945 = vrot.lane.b32.xlu1 %v2033_v32, %s1939_s1 }
 0x44c   :  { %943 = vrot.lane.b32.xlu1 %v2045_v36, %s1939_s1 }
 0x4b8   :  { %v655_v54 = vpop.xlane.xlu0 %654 }
 0x4b9   :  { %v659_v55 = vsub.f32 %v651_v44, %v655_v54 }
 0x4bb   :  { %v661_v56 = vmul.f32 1.442695, %v659_v55 }
 0x4bc   :  { %v658_v57 = vpop.xlane.xlu1 %657 }
 0x4bd   :  { %1817 = vpow2.f32 %v661_v56  ;;  %v660_v58 = vsub.f32 %v652_v52, %v658_v57 }
 0x4bf   :  { %v663_v59 = vmul.f32 1.442695, %v660_v58 }
 0x4c0   :  { %v728_v60 = vpop.permute.xlu1 %727 }
 0x4c1   :  { %1819 = vpow2.f32 %v663_v59  ;;  %v733_v61 = vsel %vm450_vm2, %v728_v60, 0 }
 0x4c2   :  { %1668 = vmatpush3.bf16.msra.mxu1 %v733_v61 }
 0x4c3   :  { %1681 = vmatprep.subr.bf16.mxu1 %v1943_v1 }
 0x4c4   :  { %v896_v17 = vpop.permute.xlu1 %895 }
 0x4c7   :  { %v1818_v62 = vpop.eup %1817 }
 0x4c8   :  { %v665_v63 = vsel %vm422_vm4, %v1818_v62, 0.0  ;;  %v946_v18 = vpop.permute.xlu1 %945 }
 0x4c9   :  { %666 = vadd.xlane.f32.xlu0 %v665_v63  ;;  %v951_v19 = vsel %vm323_vm1, %v946_v18, 0 }
 0x4cb   :  { %v1820_v0 = vpop.eup %1819 }
 0x4cc   :  { %v668_v2 = vsel %vm422_vm4, %v1820_v0, 0.0  ;;  %v944_v20 = vpop.permute.xlu1 %943 }
 0x4cd   :  { %669 = vadd.xlane.f32.xlu0 %v668_v2 }
 0x4e3   :  { %678 = vrot.lane.b32.xlu0 %v2055_v39, %s1945_s2 }
 0x4e7   :  { %893 = vrot.lane.b32.xlu0 %v2043_v35, %s1939_s1 }
 0x556   :  { %v667_v3 = vpop.xlane.xlu0 %666 }
 0x557   :  { %1821 = vrcp.f32 %v667_v3 }
 0x55a   :  { %v670_v4 = vpop.xlane.xlu0 %669 }
 0x55b   :  { %1823 = vrcp.f32 %v670_v4 }
 0x55e   :  { %v679_v5 = vpop.permute.xlu0 %678 }
 0x55f   :  { %v684_v6 = vsel %vm450_vm2, %v679_v5, 0 }
 0x560   :  { %1662 = vmatpush3.bf16.msra.mxu0 %v684_v6 }
 0x561   :  { %v1822_v7 = vpop.eup %1821  ;;  %1673 = vmatprep.subr.bf16.mxu0 %v1943_v1 }
 0x562   :  { %v673_v8 = vmul.f32 %v1822_v7, %v1818_v62  ;;  %v894_v37 = vpop.permute.xlu0 %893 }
 0x564   :  { %v675_v10 = vpack.c.bf16 %v673_v8, %v673_v8 }
 0x565   :  { %v1824_v11 = vpop.eup %1823 }
 0x566   :  { %v674_v12 = vmul.f32 %v1824_v11, %v1820_v0  ;;  %1664 = vmatmul.mubr.msk.bf16.vlgmr.msra.gmra.mrb[16].mxu0 %vm422_vm4, %v675_v10 }
 0x567   :  { %1674 = vmatpush3.bf16.msra.mxu0 %v1803_v9  ;;  %1677 = vmatprep.mubr.msk.bf16.mxu0 %vm1944_vm0, %v1943_v1 }
 0x568   :  { %v676_v14 = vpack.c.bf16 %v674_v12, %v674_v12  ;;  %1675 = vmatprep.subr.bf16.mxu0 %v1943_v1 }
 0x56a   :  { %1670 = vmatmul.mubr.msk.bf16.vlgmr.msra.gmra.mrb[16].mxu1 %vm422_vm4, %v676_v14 }
 0x56b   :  { %1682 = vmatpush3.bf16.msra.mxu1 %v1801_v13  ;;  %1685 = vmatprep.mubr.msk.bf16.mxu1 %vm1944_vm0, %v1943_v1 }
 0x56c   :  { %1683 = vmatprep.subr.bf16.mxu1 %v1943_v1  ;;  %1676 = vmatpush3.bf16.msra.mxu0 %v1804_v15 }
 0x56d   :  { %1689 = vmatprep.subr.bf16.mxu0 %v1943_v1 }
 0x56f   :  { %1684 = vmatpush3.bf16.msra.mxu1 %v1802_v16 }
 0x570   :  { %1695 = vmatprep.subr.bf16.mxu1 %v1943_v1 }
 0x572   :  { %1686 = vmatmul.mubr.msk.bf16.vlgmr.msra.gmra.mrb[20].mxu1 %vm323_vm1, %v540_v30  ;;  %v901_v30 = vsel %vm323_vm1, %v896_v17, 0 }
 0x573   :  { %1697 = vmatprep.mubr.msk.bf16.mxu1 %vm1944_vm0, %v1943_v1 }
 0x578   :  { %1696 = vmatpush3.bf16.xpose.msra.mxu1 %v951_v19 }
 0x579   :  { %1707 = vmatprep.subr.bf16.mxu1 %v1943_v1 }
 0x57f   :  { %1698 = vmatmul.mubr.msk.bf16.vlgmr.msra.gmra.mrb[24].mxu1 %vm323_vm1, %v944_v20 }
 0x580   :  { %1709 = vmatprep.mubr.msk.bf16.mxu1 %vm1944_vm0, %v1943_v1 }
 0x639   :  { %v720_v21 = vpop.f32.mrb[16].mxu0 }
 0x63a   :  { %v1665_v22 = vpop.f32.mrb[17].mxu0 }
 0x63b   :  { %v723_v23 = vpop.f32.mrb[18].mxu0 }
 0x63c   :  { %v1666_v24 = vpop.f32.mrb[19].mxu0 }
 0x63d   :  { %v769_v25 = vpop.f32.mrb[16].mxu1 }
 0x63e   :  { %v775_v26 = vpack.c.bf16 %v769_v25, %v720_v21  ;;  %v1671_v27 = vpop.f32.mrb[17].mxu1  ;;  %v1805_v21 = vld [vmem:[#allocation7 + $0x20] sm:$0xff]  }
 0x63f   :  { %v772_v28 = vpop.f32.mrb[18].mxu1 }
 0x640   :  { %v1672_v31 = vpop.f32.mrb[19].mxu1  ;;  %1678 = vmatmul.mubr.msk.bf16.vlgmr.msra.gmra.mrb[20].mxu0 %vm323_vm1, %v775_v26  ;;  %v1806_v26 = vld [vmem:[#allocation7 + $0x28] sm:$0xff]  }
 0x641   :  { %1690 = vmatpush3.bf16.xpose.msra.mxu0 %v901_v30  ;;  %1691 = vmatprep.mubr.msk.bf16.mxu0 %vm1944_vm0, %v1943_v1 }
 0x642   :  { %1701 = vmatprep.subr.bf16.mxu0 %v1943_v1 }
 0x645   :  { %v886_v33 = vpop.f32.mrb[20].mxu1 }
 0x646   :  { %v1687_v34 = vpop.f32.mrb[21].mxu1 }
 0x647   :  { %v889_v38 = vpop.f32.mrb[22].mxu1 }
 0x648   :  { %v1688_v40 = vpop.f32.mrb[23].mxu1  ;;  %1692 = vmatmul.mubr.msk.bf16.vlgmr.msra.gmra.mrb[24].mxu0 %vm323_vm1, %v894_v37 }
 0x649   :  { %1703 = vmatprep.mubr.msk.bf16.mxu0 %vm1944_vm0, %v1943_v1 }
 0x652   :  { %v987_v42 = vpop.f32.mrb[24].mxu1 }
 0x653   :  { %v994_v43 = vmul.f32 0.17677669, %v987_v42  ;;  %v1699_v44 = vpop.f32.mrb[25].mxu1 }
 0x654   :  { %v990_v45 = vpop.f32.mrb[26].mxu1 }
 0x655   :  { %v1700_v46 = vpop.f32.mrb[27].mxu1  ;;  %v996_v47 = vsel %vm2065_vm3, %v994_v43, -1e+30 }
 0x656   :  { %v1000_v48 = vsel %vm422_vm4, %v996_v47, -inf }
 0x657   :  { %1001 = vmax.xlane.f32.xlu1 %v1000_v48 }
 0x668   :  { %1069 = vrot.lane.b32.xlu1 %v2057_v41, %s1939_s1 }
 0x66c   :  { %1183 = vrot.lane.b32.xlu1 %v2031_v29, %s1946_s27 }
 0x670   :  { %1233 = vrot.lane.b32.xlu1 %v2033_v32, %s1946_s27 }
 0x674   :  { %1231 = vrot.lane.b32.xlu1 %v2045_v36, %s1946_s27 }
 0x6e4   :  { %v1002_v50 = vpop.xlane.xlu1 %1001 }
 0x6e5   :  { %v1004_v53 = vsub.f32 %v996_v47, %v1002_v50 }
 0x6e7   :  { %v1007_v54 = vmul.f32 1.442695, %v1004_v53 }
 0x6e8   :  { %v1070_v51 = vpop.permute.xlu1 %1069 }
 0x6e9   :  { %v1075_v52 = vsel %vm450_vm2, %v1070_v51, 0  ;;  %1825 = vpow2.f32 %v1007_v54 }
 0x6ea   :  { %1708 = vmatpush3.bf16.msra.mxu1 %v1075_v52 }
 0x6eb   :  { %1721 = vmatprep.subr.bf16.mxu1 %v1943_v1 }
 0x6ec   :  { %v1184_v12 = vpop.permute.xlu1 %1183 }
 0x6ed   :  { %v1189_v14 = vsel %vm323_vm1, %v1184_v12, 0 }
 0x6f3   :  { %v1826_v2 = vpop.eup %1825 }
 0x6f4   :  { %v1012_v3 = vsel %vm422_vm4, %v1826_v2, 0.0 }
 0x713   :  { %v830_v55 = vpop.f32.mrb[20].mxu0 }
 0x714   :  { %v2171_v56 = vadd.f32 %v886_v33, %v830_v55  ;;  %v1679_v57 = vpop.f32.mrb[21].mxu0 }
 0x715   :  { %v833_v29 = vpop.f32.mrb[22].mxu0 }
 0x716   :  { %v2173_v58 = vadd.f32 %v889_v38, %v833_v29  ;;  %v1680_v32 = vpop.f32.mrb[23].mxu0  ;;  %v1234_v38 = vpop.permute.xlu1 %1233 }
 0x717   :  { %v1239_v45 = vsel %vm323_vm1, %v1234_v38, 0 }
 0x71a   :  { %v1232_v47 = vpop.permute.xlu1 %1231 }
 0x71b   :  { %v937_v59 = vpop.f32.mrb[24].mxu0 }
 0x71c   :  { %v993_v36 = vmul.f32 0.17677669, %v937_v59  ;;  %v1693_v60 = vpop.f32.mrb[25].mxu0 }
 0x71d   :  { %v940_v61 = vpop.f32.mrb[26].mxu0 }
 0x71e   :  { %v1694_v62 = vpop.f32.mrb[27].mxu0  ;;  %v995_v63 = vsel %vm2065_vm3, %v993_v36, -1e+30 }
 0x71f   :  { %v997_v0 = vsel %vm422_vm4, %v995_v63, -inf }
 0x720   :  { %998 = vmax.xlane.f32.xlu0 %v997_v0 }
 0x724   :  { %1013 = vadd.xlane.f32.xlu0 %v1012_v3 }
 0x7ad   :  { %v999_v4 = vpop.xlane.xlu0 %998 }
 0x7ae   :  { %v1003_v5 = vsub.f32 %v995_v63, %v999_v4 }
 0x7b0   :  { %v1005_v6 = vmul.f32 1.442695, %v1003_v5 }
 0x7b1   :  { %v1014_v7 = vpop.xlane.xlu0 %1013 }
 0x7b2   :  { %1827 = vpow2.f32 %v1005_v6 }
 0x7b3   :  { %1829 = vrcp.f32 %v1014_v7 }
 0x7bc   :  { %v1828_v8 = vpop.eup %1827 }
 0x7bd   :  { %v1830_v9 = vpop.eup %1829  ;;  %v1009_v10 = vsel %vm422_vm4, %v1828_v8, 0.0 }
 0x7be   :  { %v1018_v11 = vmul.f32 %v1830_v9, %v1826_v2  ;;  %1010 = vadd.xlane.f32.xlu0 %v1009_v10 }
 0x7c0   :  { %v1020_v13 = vpack.c.bf16 %v1018_v11, %v1018_v11 }
 0x7c2   :  { %1710 = vmatmul.mubr.msk.bf16.vlgmr.msra.gmra.mrb[28].mxu1 %vm422_vm4, %v1020_v13 }
 0x7c3   :  { %1722 = vmatpush3.bf16.xpose.msra.mxu1 %v1189_v14  ;;  %1723 = vmatprep.mubr.msk.bf16.mxu1 %vm1944_vm0, %v1943_v1 }
 0x7c4   :  { %1733 = vmatprep.subr.bf16.mxu1 %v1943_v1 }
 0x7d4   :  { %1021 = vrot.lane.b32.xlu0 %v2055_v39, %s1939_s1 }
 0x7d8   :  { %1181 = vrot.lane.b32.xlu0 %v2043_v35, %s1946_s27 }
 0x84b   :  { %v1011_v15 = vpop.xlane.xlu0 %1010 }
 0x84c   :  { %1831 = vrcp.f32 %v1011_v15  ;;  %v1807_v15 = vld [vmem:[#allocation7 + $0x30] sm:$0xff]  }
 0x84f   :  { %v1022_v16 = vpop.permute.xlu0 %1021 }
 0x850   :  { %v1027_v17 = vsel %vm450_vm2, %v1022_v16, 0  ;;  %v1808_v16 = vld [vmem:[#allocation7 + $0x38] sm:$0xff]  }
 0x851   :  { %1702 = vmatpush3.bf16.msra.mxu0 %v1027_v17 }
 0x852   :  { %1713 = vmatprep.subr.bf16.mxu0 %v1943_v1 }
 0x853   :  { %v1182_v18 = vpop.permute.xlu0 %1181 }
 0x854   :  { %1724 = vmatmul.mubr.msk.bf16.vlgmr.msra.gmra.mrb[32].mxu1 %vm323_vm1, %v1182_v18 }
 0x855   :  { %1735 = vmatprep.mubr.msk.bf16.mxu1 %vm1944_vm0, %v1943_v1 }
 0x856   :  { %v1832_v19 = vpop.eup %1831 }
 0x857   :  { %v1017_v20 = vmul.f32 %v1832_v19, %v1828_v8 }
 0x859   :  { %v1019_v22 = vpack.c.bf16 %v1017_v20, %v1017_v20 }
 0x85b   :  { %1704 = vmatmul.mubr.msk.bf16.vlgmr.msra.gmra.mrb[28].mxu0 %vm422_vm4, %v1019_v22 }
 0x85c   :  { %1714 = vmatpush3.bf16.msra.mxu0 %v1805_v21  ;;  %1717 = vmatprep.mubr.msk.bf16.mxu0 %vm1944_vm0, %v1943_v1 }
 0x85d   :  { %1715 = vmatprep.subr.bf16.mxu0 %v1943_v1 }
 0x860   :  { %1716 = vmatpush3.bf16.msra.mxu0 %v1806_v26  ;;  %v1551_v26 = vld [vmem:[%s2248_s3] ss:$0 sm:$0xff] }
 0x861   :  { %1727 = vmatprep.subr.bf16.mxu0 %v1943_v1 }
 0x895   :  { %v1111_v35 = vpop.f32.mrb[28].mxu1 }
 0x896   :  { %v1711_v23 = vpop.f32.mrb[29].mxu1 }
 0x897   :  { %v1114_v24 = vpop.f32.mrb[30].mxu1 }
 0x898   :  { %v1712_v25 = vpop.f32.mrb[31].mxu1 }
 0x927   :  { %v1225_v27 = vpop.f32.mrb[32].mxu1 }
 0x928   :  { %v1281_v28 = vmul.f32 0.17677669, %v1225_v27  ;;  %v1725_v30 = vpop.f32.mrb[33].mxu1 }
 0x929   :  { %v1228_v31 = vpop.f32.mrb[34].mxu1 }
 0x92a   :  { %v1726_v33 = vpop.f32.mrb[35].mxu1  ;;  %v1283_v34 = vsel %vm2065_vm3, %v1281_v28, -1e+30 }
 0x92b   :  { %v1285_v37 = vsel %vm422_vm4, %v1283_v34, -inf }
 0x92c   :  { %1286 = vmax.xlane.f32.xlu0 %v1285_v37 }
 0x92e   :  { %v1063_v40 = vpop.f32.mrb[28].mxu0 }
 0x92f   :  { %v1117_v42 = vpack.c.bf16 %v1111_v35, %v1063_v40  ;;  %v1705_v43 = vpop.f32.mrb[29].mxu0 }
 0x930   :  { %v1066_v44 = vpop.f32.mrb[30].mxu0 }
 0x931   :  { %v1706_v46 = vpop.f32.mrb[31].mxu0  ;;  %1718 = vmatmul.mubr.msk.bf16.vlgmr.msra.gmra.mrb[32].mxu0 %vm323_vm1, %v1117_v42 }
 0x932   :  { %1728 = vmatpush3.bf16.xpose.msra.mxu0 %v1239_v45  ;;  %1729 = vmatprep.mubr.msk.bf16.mxu0 %vm1944_vm0, %v1943_v1 }
 0x933   :  { %1739 = vmatprep.subr.bf16.mxu0 %v1943_v1 }
 0x939   :  { %1730 = vmatmul.mubr.msk.bf16.vlgmr.msra.gmra.mrb[36].mxu0 %vm323_vm1, %v1232_v47 }
 0x93a   :  { %1741 = vmatprep.mubr.msk.bf16.mxu0 %vm1944_vm0, %v1943_v1 }
 0x9b9   :  { %v1287_v48 = vpop.xlane.xlu0 %1286 }
 0x9ba   :  { %v1291_v50 = vsub.f32 %v1283_v34, %v1287_v48 }
 0x9bc   :  { %v1293_v51 = vmul.f32 1.442695, %v1291_v50 }
 0x9be   :  { %1833 = vpow2.f32 %v1293_v51 }
 0x9c8   :  { %v1834_v52 = vpop.eup %1833 }
 0x9c9   :  { %v1297_v53 = vsel %vm422_vm4, %v1834_v52, 0.0 }
 0x9ca   :  { %1298 = vadd.xlane.f32.xlu0 %v1297_v53 }
 0xa04   :  { %v1172_v54 = vpop.f32.mrb[32].mxu0 }
 0xa05   :  { %v1179_v55 = vadd.f32 %v1172_v54, %v2171_v56  ;;  %v1719_v57 = vpop.f32.mrb[33].mxu0 }
 0xa06   :  { %v1175_v29 = vpop.f32.mrb[34].mxu0 }
 0xa07   :  { %v1180_v32 = vadd.f32 %v1175_v29, %v2173_v58  ;;  %v1720_v59 = vpop.f32.mrb[35].mxu0 }
 0xa0c   :  { %v1275_v36 = vpop.f32.mrb[36].mxu0 }
 0xa0d   :  { %v1282_v60 = vmul.f32 0.17677669, %v1275_v36  ;;  %v1731_v61 = vpop.f32.mrb[37].mxu0 }
 0xa0e   :  { %v1278_v62 = vpop.f32.mrb[38].mxu0 }
 0xa0f   :  { %v1732_v63 = vpop.f32.mrb[39].mxu0  ;;  %v1284_v0 = vsel %vm2065_vm3, %v1282_v60, -1e+30 }
 0xa10   :  { %v1288_v2 = vsel %vm422_vm4, %v1284_v0, -inf }
 0xa11   :  { %1289 = vmax.xlane.f32.xlu1 %v1288_v2 }
 0xa22   :  { %1357 = vrot.lane.b32.xlu1 %v2057_v41, %s1946_s27 }
 0xa57   :  { %v1299_v49 = vpop.xlane.xlu0 %1298 }
 0xa9e   :  { %v1290_v56 = vpop.xlane.xlu1 %1289 }
 0xa9f   :  { %v1292_v3 = vsub.f32 %v1284_v0, %v1290_v56 }
 0xaa1   :  { %v1295_v4 = vmul.f32 1.442695, %v1292_v3 }
 0xaa2   :  { %v1358_v5 = vpop.permute.xlu1 %1357 }
 0xaa3   :  { %1835 = vpow2.f32 %v1295_v4  ;;  %v1363_v58 = vsel %vm450_vm2, %v1358_v5, 0 }
 0xaa4   :  { %1740 = vmatpush3.bf16.msra.mxu0 %v1363_v58  ;;  %1837 = vrcp.f32 %v1299_v49 }
 0xaad   :  { %v1836_v6 = vpop.eup %1835 }
 0xaae   :  { %v1300_v7 = vsel %vm422_vm4, %v1836_v6, 0.0  ;;  %v1838_v8 = vpop.eup %1837 }
 0xaaf   :  { %1301 = vadd.xlane.f32.xlu0 %v1300_v7  ;;  %v1305_v41 = vmul.f32 %v1838_v8, %v1834_v52 }
 0xab1   :  { %v1307_v12 = vpack.c.bf16 %v1305_v41, %v1305_v41 }
 0xac5   :  { %1309 = vrot.lane.b32.xlu0 %v2055_v39, %s1946_s27 }
 0xb3c   :  { %v1302_v9 = vpop.xlane.xlu0 %1301 }
 0xb3d   :  { %1839 = vrcp.f32 %v1302_v9 }
 0xb40   :  { %v1310_v10 = vpop.permute.xlu0 %1309 }
 0xb41   :  { %v1315_v11 = vsel %vm450_vm2, %v1310_v10, 0 }
 0xb42   :  { %1734 = vmatpush3.bf16.msra.mxu1 %v1315_v11 }
 0xb43   :  { %1745 = vmatprep.subr.bf16.mxu1 %v1943_v1 }
 0xb45   :  { %1736 = vmatmul.mubr.msk.bf16.vlgmr.msra.gmra.mrb[36].mxu1 %vm422_vm4, %v1307_v12 }
 0xb46   :  { %1749 = vmatprep.mubr.msk.bf16.mxu1 %vm1944_vm0, %v1943_v1  ;;  %1746 = vmatpush3.bf16.msra.mxu1 %v1807_v15 }
 0xb47   :  { %v1840_v13 = vpop.eup %1839  ;;  %1747 = vmatprep.subr.bf16.mxu1 %v1943_v1 }
 0xb48   :  { %v1306_v39 = vmul.f32 %v1840_v13, %v1836_v6 }
 0xb4a   :  { %v1308_v14 = vpack.c.bf16 %v1306_v39, %v1306_v39  ;;  %1748 = vmatpush3.bf16.msra.mxu1 %v1808_v16 }
 0xb4c   :  { %1742 = vmatmul.mubr.msk.bf16.vlgmr.msra.gmra.mrb[40].mxu0 %vm422_vm4, %v1308_v14 }
 0xc18   :  { %v1351_v17 = vpop.f32.mrb[36].mxu1 }
 0xc19   :  { %v1737_v18 = vpop.f32.mrb[37].mxu1 }
 0xc1a   :  { %v1354_v19 = vpop.f32.mrb[38].mxu1 }
 0xc1b   :  { %v1738_v20 = vpop.f32.mrb[39].mxu1 }
 0xc1f   :  { %v1399_v21 = vpop.f32.mrb[40].mxu0 }
 0xc20   :  { %v1405_v22 = vpack.c.bf16 %v1399_v21, %v1351_v17  ;;  %v1743_v35 = vpop.f32.mrb[41].mxu0 }
 0xc21   :  { %v1402_v23 = vpop.f32.mrb[42].mxu0 }
 0xc22   :  { %v1744_v24 = vpop.f32.mrb[43].mxu0  ;;  %1750 = vmatmul.mubr.msk.bf16.vlgmr.msra.gmra.mrb[40].mxu1 %vm323_vm1, %v1405_v22 }
 0xcf5   :  { %v1460_v25 = vpop.f32.mrb[40].mxu1 }
 0xcf6   :  { %v1467_v27 = vadd.f32 %v1460_v25, %v1179_v55  ;;  %v1751_v1 = vpop.f32.mrb[41].mxu1 }
 0xcf7   :  { %v1463_v28 = vpop.f32.mrb[42].mxu1 }
 0xcf8   :  { %v1476_v30 = vadd.f32 %v1551_v26, %v1467_v27  ;;  %v1468_v31 = vadd.f32 %v1463_v28, %v1180_v32  ;;  %v1752_v33 = vpop.f32.mrb[43].mxu1 }
 0xcfa   :  { %1478 = vst [vmem:[#allocation8] sm:$0xff] %v1476_v30  ;;  %v1477_v34 = vadd.f32 %v1551_v26, %v1468_v31 }
 0xcfc   :  { %1479 = vst [vmem:[#allocation8 + $0x8] sm:$0xff] %v1477_v34 }
 0xcfd   :  { %1918 = shalt.err (!%p1915_p0)
}
 0xcfe   :  { %s1919_s8 = scalar_lea.hbm %s2249_s4, 256 }
 0xcff   :  { %p1920_p1 = scmp.ne.s32.totalorder %s2249_s4, %s1919_s8  ;;  %p1923_p2 = scmp.lt.u32.totalorder %s1919_s8, %s2249_s4 }
 0xd01   :  { %p1925_p3 = pnand %p1923_p2, %p1920_p1 }
 0xd03   :  { %1928 = shalt.err (!%p1925_p3)
}
 0xd04   :  { %s1948_s1 = smov 128   ;;  %s1949_s13 = smov 8  }
 0xd05   :  { %1491 = dma.vmem_to_hbm [thread:$0]  %s1486_s5, 256, %s2249_s4, [#allocation4], %s1948_s1, %s1948_s1, %s1949_s13  }
 0xd06   :  { %1933 = dma.done.wait [#allocation4], 256  }
 0xd07   :  { %1934 = vsyncadd [#allocation4], 4294967040 }
 0xd08   :  { %1495 = vsyncpa [#allocation3], 1 }
 0xd09   :  { %1496 = vsyncpa [#allocation6], 1 }
 0xd0a   :  { %1497 = vsyncpa [#allocation4], 1 }

</bundles_post_ra>
